<compile_context>
chip_gen: v7x
topology: tpu7x:2x2x1
jax: 0.10.0
libtpu: 0.0.40
codegen_flags: <defaults>
</compile_context>

<pallas_src>
import functools

import jax
import jax.numpy as jnp
from jax.experimental import pallas as pl
from jax.experimental.pallas import tpu as pltpu


# ----------------------------------------------------------------------------
# Pallas kernel: whole MLP forward for one row tile of the input.
# refs = (x_ref, [w_i, t_i] * num_hidden, w_last, b_last, o_ref)
#   w_i    : bf16 (BN scale pre-folded)         -> MXU operand
#   t_i    : f32 (1, hidden) shift (bias+BN folded)
#   w_last : bf16, b_last : f32 (1, d_out)
# ----------------------------------------------------------------------------
def mlp_kernel(*refs, num_hidden):
    x_ref = refs[0]
    o_ref = refs[-1]
    h = x_ref[...]                                   # f32 activations
    idx = 1
    for _ in range(num_hidden):
        w_ref, t_ref = refs[idx], refs[idx + 1]
        idx += 2
        # Linear+BN folded: bf16 operands, f32 MXU accumulation.
        z = jnp.dot(h.astype(w_ref.dtype), w_ref[...],
                    preferred_element_type=jnp.float32)
        # shift + ReLU kept in f32 on the VPU.
        h = jnp.maximum(z + t_ref[...], 0.0)
    w_ref, b_ref = refs[idx], refs[idx + 1]
    o_ref[...] = (jnp.dot(h.astype(w_ref.dtype), w_ref[...],
                          preferred_element_type=jnp.float32)
                  + b_ref[...])


# ----------------------------------------------------------------------------
# Row-tile selection: biggest tile that keeps >= 4 grid steps (2 per TC on
# v7x) so pipelining + megacore sharding both work; small batches get one
# full-array block.
# ----------------------------------------------------------------------------
def _pick_tile(m, min_steps=4):
    for tm in (512, 256, 128):
        if m // tm >= min_steps:
            return tm
    if m >= 128:
        return 128
    return m                       # single block == full array dim (allowed)


# ----------------------------------------------------------------------------
# pallas_call wrapper
# ----------------------------------------------------------------------------
def mlp_forward(params, x):
    M, d_in = x.shape
    hidden = params['hidden']
    w_last, b_last = params['w_last'], params['b_last']
    d_out = w_last.shape[1]

    tm = _pick_tile(M)
    grid = (pl.cdiv(M, tm),)       # no host-side pad; partial block masked

    def resident(arr):             # constant index_map -> VMEM-resident
        nd = arr.ndim
        return pl.BlockSpec(arr.shape, lambda i, _nd=nd: (0,) * _nd)

    flat_args = [x]
    in_specs = [pl.BlockSpec((tm, d_in), lambda i: (i, 0))]
    for lp in hidden:
        flat_args += [lp['w'], lp['t']]
        in_specs += [resident(lp['w']), resident(lp['t'])]
    flat_args += [w_last, b_last]
    in_specs += [resident(w_last), resident(b_last)]
    # NOTE: at these dims the (double-buffered) resident weights are tiny; for
    # hidden_dim in the thousands on v7x, give them pipeline_mode=pl.Buffered(1)
    # or tile their K/N dims.

    # VMEM budget from actual buffer sizes (double-buffered) + headroom.
    act_bytes = tm * d_in * 4 + tm * d_out * 4
    wgt_bytes = sum(int(a.size) * a.dtype.itemsize for a in flat_args[1:])
    vmem_limit = int(min(128 * 1024 * 1024,
                         max(16 * 1024 * 1024,
                             2 * (act_bytes + wgt_bytes) + 4 * 1024 * 1024)))

    kern = functools.partial(mlp_kernel, num_hidden=len(hidden))
    return pl.pallas_call(
        kern,
        out_shape=jax.ShapeDtypeStruct((M, d_out), jnp.float32),
        grid=grid,
        in_specs=in_specs,
        out_specs=pl.BlockSpec((tm, d_out), lambda i: (i, 0)),
        compiler_params=pltpu.CompilerParams(
            dimension_semantics=("parallel",),
            vmem_limit_bytes=vmem_limit),
    )(*flat_args)


# ----------------------------------------------------------------------------
# Parameter init (matches nn.Linear / nn.BatchNorm1d defaults, eval mode).
# BN scale folded into weights; Linear bias folded into the shift.
# ----------------------------------------------------------------------------
def linear_init(key, fan_in, fan_out):
    k1, k2 = jax.random.split(key)
    bound = 1.0 / jnp.sqrt(jnp.float32(fan_in))
    w = jax.random.uniform(k1, (fan_in, fan_out), jnp.float32, -bound, bound)
    b = jax.random.uniform(k2, (1, fan_out), jnp.float32, -bound, bound)
    return w, b


def init_params(key, num_layers, input_dim, hidden_dim, output_dim):
    if num_layers < 1:
        raise ValueError('number of layers should be positive!')
    keys = jax.random.split(key, max(num_layers, 2))
    bn_eps = 1e-5
    bn_scale = 1.0 / jnp.sqrt(jnp.float32(1.0 + bn_eps))   # gamma=1, var=1
    hidden = []
    d_prev = input_dim
    for i in range(num_layers - 1):
        w, b = linear_init(keys[i], d_prev, hidden_dim)
        # BN(x@w + b) = x@(w*scale) + (b*scale + shift); shift=0 (mean=0,beta=0)
        hidden.append(dict(w=(w * bn_scale).astype(jnp.bfloat16),
                           t=(b * bn_scale).astype(jnp.float32)))
        d_prev = hidden_dim
    w_last, b_last = linear_init(keys[num_layers - 1], d_prev, output_dim)
    return dict(hidden=hidden,
                w_last=w_last.astype(jnp.bfloat16),
                b_last=b_last.astype(jnp.float32))


# ----------------------------------------------------------------------------
# Pure-JAX reference at matched precision (bf16 matmul operands, f32 accum).
# ----------------------------------------------------------------------------
def reference_forward(params, x):
    h = x
    for lp in params['hidden']:
        z = jnp.dot(h.astype(jnp.bfloat16), lp['w'],
                    preferred_element_type=jnp.float32)
        h = jax.nn.relu(z + lp['t'])
    z = jnp.dot(h.astype(jnp.bfloat16), params['w_last'],
                preferred_element_type=jnp.float32)
    return z + params['b_last']


if __name__ == "__main__":
    NUM_LAYERS, D_IN, D_HID, D_OUT = 3, 64, 128, 128
    BATCH = 200   # deliberately NOT a multiple of the tile: exercises the
                  # no-pad / masked-partial-block path.

    key = jax.random.PRNGKey(0)
    kp, kx = jax.random.split(key)
    params = init_params(kp, NUM_LAYERS, D_IN, D_HID, D_OUT)
    x = jax.random.normal(kx, (BATCH, D_IN), jnp.float32)

    out = mlp_forward(params, x)
    out = jax.block_until_ready(out)

    ref = reference_forward(params, x)
    assert out.shape == (BATCH, D_OUT)
    assert bool(jnp.all(jnp.isfinite(out)))
    assert jnp.allclose(out, ref, rtol=1e-2, atol=1e-2), \
        float(jnp.max(jnp.abs(out - ref)))
    print("KERNEL_OK")
</pallas_src>

<mosaic_0001>
module attributes {stable_mosaic.version = 11 : i64} {
  func.func @mlp_kernel(%arg0: i32, %arg1: memref<128x64xf32, #tpu.memory_space<vmem>>, %arg2: memref<64x128xbf16, #tpu.memory_space<vmem>>, %arg3: memref<1x128xf32, #tpu.memory_space<vmem>>, %arg4: memref<128x128xbf16, #tpu.memory_space<vmem>>, %arg5: memref<1x128xf32, #tpu.memory_space<vmem>>, %arg6: memref<128x128xbf16, #tpu.memory_space<vmem>>, %arg7: memref<1x128xf32, #tpu.memory_space<vmem>>, %arg8: memref<128x128xf32, #tpu.memory_space<vmem>>) attributes {dimension_semantics = [#tpu.dimension_semantics<parallel>], iteration_bounds = array<i64: 2>, scalar_prefetch = 0 : i64, scratch_operands = 0 : i64, tpu.core_type = #tpu.core_type<tc>, window_params = [{transform_indices = @transform_0, window_bounds = array<i64: 128, 64>}, {pipeline_mode = #tpu.pipeline_mode<synchronous>, transform_indices = @transform_1, window_bounds = array<i64: 64, 128>}, {pipeline_mode = #tpu.pipeline_mode<synchronous>, transform_indices = @transform_2, window_bounds = array<i64: 1, 128>}, {pipeline_mode = #tpu.pipeline_mode<synchronous>, transform_indices = @transform_3, window_bounds = array<i64: 128, 128>}, {pipeline_mode = #tpu.pipeline_mode<synchronous>, transform_indices = @transform_4, window_bounds = array<i64: 1, 128>}, {pipeline_mode = #tpu.pipeline_mode<synchronous>, transform_indices = @transform_5, window_bounds = array<i64: 128, 128>}, {pipeline_mode = #tpu.pipeline_mode<synchronous>, transform_indices = @transform_6, window_bounds = array<i64: 1, 128>}, {transform_indices = @transform_7, window_bounds = array<i64: 128, 128>}]} {
    %c0 = arith.constant 0 : index
    %c0_0 = arith.constant 0 : index
    %0 = vector.load %arg1[%c0, %c0_0] : memref<128x64xf32, #tpu.memory_space<vmem>>, vector<128x64xf32>
    %1 = arith.truncf %0 : vector<128x64xf32> to vector<128x64xbf16>
    %c0_1 = arith.constant 0 : index
    %c0_2 = arith.constant 0 : index
    %2 = vector.load %arg2[%c0_1, %c0_2] : memref<64x128xbf16, #tpu.memory_space<vmem>>, vector<64x128xbf16>
    %cst = arith.constant dense<0.000000e+00> : vector<128x128xf32>
    %3 = tpu.matmul %1, %2, %cst {dimension_numbers = #tpu.dot_dimension_numbers<[1], [0], [0], [1], [0, 0, 1, 1], [], []>} : vector<128x64xbf16>, vector<64x128xbf16>, vector<128x128xf32> -> vector<128x128xf32>
    %c0_3 = arith.constant 0 : index
    %c0_4 = arith.constant 0 : index
    %4 = vector.load %arg3[%c0_3, %c0_4] : memref<1x128xf32, #tpu.memory_space<vmem>>, vector<1x128xf32>
    %5 = vector.broadcast %4 : vector<1x128xf32> to vector<128x128xf32>
    %6 = arith.addf %3, %5 : vector<128x128xf32>
    %cst_5 = arith.constant 0.000000e+00 : f32
    %7 = vector.broadcast %cst_5 : f32 to vector<128x128xf32>
    %8 = arith.maximumf %6, %7 : vector<128x128xf32>
    %9 = arith.truncf %8 : vector<128x128xf32> to vector<128x128xbf16>
    %c0_6 = arith.constant 0 : index
    %c0_7 = arith.constant 0 : index
    %10 = vector.load %arg4[%c0_6, %c0_7] : memref<128x128xbf16, #tpu.memory_space<vmem>>, vector<128x128xbf16>
    %cst_8 = arith.constant dense<0.000000e+00> : vector<128x128xf32>
    %11 = tpu.matmul %9, %10, %cst_8 {dimension_numbers = #tpu.dot_dimension_numbers<[1], [0], [0], [1], [0, 0, 1, 1], [], []>} : vector<128x128xbf16>, vector<128x128xbf16>, vector<128x128xf32> -> vector<128x128xf32>
    %c0_9 = arith.constant 0 : index
    %c0_10 = arith.constant 0 : index
    %12 = vector.load %arg5[%c0_9, %c0_10] : memref<1x128xf32, #tpu.memory_space<vmem>>, vector<1x128xf32>
    %13 = vector.broadcast %12 : vector<1x128xf32> to vector<128x128xf32>
    %14 = arith.addf %11, %13 : vector<128x128xf32>
    %cst_11 = arith.constant 0.000000e+00 : f32
    %15 = vector.broadcast %cst_11 : f32 to vector<128x128xf32>
    %16 = arith.maximumf %14, %15 : vector<128x128xf32>
    %17 = arith.truncf %16 : vector<128x128xf32> to vector<128x128xbf16>
    %c0_12 = arith.constant 0 : index
    %c0_13 = arith.constant 0 : index
    %18 = vector.load %arg6[%c0_12, %c0_13] : memref<128x128xbf16, #tpu.memory_space<vmem>>, vector<128x128xbf16>
    %cst_14 = arith.constant dense<0.000000e+00> : vector<128x128xf32>
    %19 = tpu.matmul %17, %18, %cst_14 {dimension_numbers = #tpu.dot_dimension_numbers<[1], [0], [0], [1], [0, 0, 1, 1], [], []>} : vector<128x128xbf16>, vector<128x128xbf16>, vector<128x128xf32> -> vector<128x128xf32>
    %c0_15 = arith.constant 0 : index
    %c0_16 = arith.constant 0 : index
    %20 = vector.load %arg7[%c0_15, %c0_16] : memref<1x128xf32, #tpu.memory_space<vmem>>, vector<1x128xf32>
    %21 = vector.broadcast %20 : vector<1x128xf32> to vector<128x128xf32>
    %22 = arith.addf %19, %21 : vector<128x128xf32>
    %c0_17 = arith.constant 0 : index
    %c0_18 = arith.constant 0 : index
    %23 = vector.load %arg8[%c0_17, %c0_18] : memref<128x128xf32, #tpu.memory_space<vmem>>, vector<128x128xf32>
    tpu.vector_store %arg8[%c0_17, %c0_18], %22 {strides = array<i32>} : memref<128x128xf32, #tpu.memory_space<vmem>>, vector<128x128xf32>,
    return
  }
  func.func @transform_0(%arg0: i32) -> (i32, i32) {
    %c0_i32 = arith.constant 0 : i32
    %c0_i32_0 = arith.constant 0 : i32
    return %arg0, %c0_i32 : i32, i32
  }
  func.func @transform_1(%arg0: i32) -> (i32, i32) {
    %c0_i32 = arith.constant 0 : i32
    %c0_i32_0 = arith.constant 0 : i32
    %c0_i32_1 = arith.constant 0 : i32
    return %c0_i32, %c0_i32_0 : i32, i32
  }
  func.func @transform_2(%arg0: i32) -> (i32, i32) {
    %c0_i32 = arith.constant 0 : i32
    %c0_i32_0 = arith.constant 0 : i32
    %c0_i32_1 = arith.constant 0 : i32
    return %c0_i32, %c0_i32_0 : i32, i32
  }
  func.func @transform_3(%arg0: i32) -> (i32, i32) {
    %c0_i32 = arith.constant 0 : i32
    %c0_i32_0 = arith.constant 0 : i32
    %c0_i32_1 = arith.constant 0 : i32
    return %c0_i32, %c0_i32_0 : i32, i32
  }
  func.func @transform_4(%arg0: i32) -> (i32, i32) {
    %c0_i32 = arith.constant 0 : i32
    %c0_i32_0 = arith.constant 0 : i32
    %c0_i32_1 = arith.constant 0 : i32
    return %c0_i32, %c0_i32_0 : i32, i32
  }
  func.func @transform_5(%arg0: i32) -> (i32, i32) {
    %c0_i32 = arith.constant 0 : i32
    %c0_i32_0 = arith.constant 0 : i32
    %c0_i32_1 = arith.constant 0 : i32
    return %c0_i32, %c0_i32_0 : i32, i32
  }
  func.func @transform_6(%arg0: i32) -> (i32, i32) {
    %c0_i32 = arith.constant 0 : i32
    %c0_i32_0 = arith.constant 0 : i32
    %c0_i32_1 = arith.constant 0 : i32
    return %c0_i32, %c0_i32_0 : i32, i32
  }
  func.func @transform_7(%arg0: i32) -> (i32, i32) {
    %c0_i32 = arith.constant 0 : i32
    %c0_i32_0 = arith.constant 0 : i32
    return %arg0, %c0_i32 : i32, i32
  }
}

</mosaic_0001>

<bundles_post_ra>
// kernel: tpu_custom_call.1
= control target key start
LH: loop header
LB: loop body
LE: loop exit
PB: predicated region body
PF: predicated region fallthrough
CT: control target
= control target key end

     0   :  { %12 = vsyncpa [#allocation3], 0  ;;  %s1606_s0 = inlined_call_operand.vmem [shape: f32[200,64], index: 0, kind: input, shape index: {}]   ;;  %s1607_s1 = inlined_call_operand.vmem [shape: bf16[64,128], index: 1, kind: input, shape index: {}]   ;;  %s1608_s2 = inlined_call_operand.vmem [shape: f32[1,128], index: 2, kind: input, shape index: {}]   ;;  %s1609_s3 = inlined_call_operand.vmem [shape: bf16[128,128], index: 3, kind: input, shape index: {}]   ;;  %s1610_s4 = inlined_call_operand.vmem [shape: f32[1,128], index: 4, kind: input, shape index: {}]   ;;  %s1611_s5 = inlined_call_operand.vmem [shape: bf16[128,128], index: 5, kind: input, shape index: {}]   ;;  %s1612_s6 = inlined_call_operand.vmem [shape: f32[1,128], index: 6, kind: input, shape index: {}]   ;;  %s1613_s7 = inlined_call_operand.hbm [shape: f32[200,128], index: 7, kind: output, shape index: {}]  }
   0x1   :  { %14 = vsyncpa [#allocation3 + $0x1], 0  ;;  %s1335_s24 = smov 0   ;;  %s1337_s25 = smov 0  }
   0x2   :  { %s1339_s26 = smov 0   ;;  %s1341_s27 = smov 0  }
   0x3 LB: > { %s1356_s28 = sadd.s32 4294967295, %s1290_s27   ;;  %s972_s29 = sadd.s32 4294967294, %s1290_s27   ;;  %s1290_s27 = sphi %s1341_s27, %s1619_s27   ;;  %s1286_s26 = sphi %s1339_s26, %s1618_s26   ;;  %s1282_s25 = sphi %s1337_s25, %s1617_s25   ;;  %s1278_s24 = sphi %s1335_s24, %s1616_s24  }
   0x4   : > { %s1360_s30 = sadd.s32 1, %s1290_s27   ;;  %s179_s8 = sadd.s32 1, %s1286_s26 }
   0x5   : > { %s176_s9 = ssub.s32 %s1290_s27, %s1360_s30  ;;  %p189_p0 = scmp.ne.s32.totalorder %s1286_s26, %s1282_s25 }
   0x6   : > { %p177_p1 = scmp.eq.s32.totalorder %s176_s9, 0  ;;  %p190_p2 = scmp.eq.s32.totalorder %s1356_s28, 1 }
   0x7   : > { %p195_p3 = scmp.ne.s32.totalorder %s1282_s25, %s1278_s24  ;;  %p196_p4 = scmp.eq.s32.totalorder %s972_s29, 1 }
   0x8   : > { %s1371_s10 = scalar_select %p177_p1, %s1286_s26, %s179_s8  }
   0x9   : > { %p1373_p5 = por %p190_p2, %p189_p0  ;;  %p1377_p6 = por %p196_p4, %p195_p3 }
   0xa   : > { %p975_p7 = scmp.ge.s32.totalorder %s1290_s27, 1  ;;  %p249_p8 = scmp.lt.s32.totalorder %s1290_s27, 3 }
   0xc   : > { %p250_p9 = pnand %p975_p7, %p249_p8 }
   0xd   : > { %v1208_v0 = vld [vmem:[%s1607_s1] sm:$0xff] (!%p250_p9)   ;;  %s1387_s15 = sshll.u32 (!%p250_p9), %s1356_s28, 4  ;;  %v1209_v1 = vld [vmem:[%s1607_s1 + $0x8] sm:$0xff] (!%p250_p9)   ;;  %v1210_v2 = vld [vmem:[%s1607_s1 + $0x10] sm:$0xff] (!%p250_p9)   ;;  %vm368_vm0 = vcmask (!%p250_p9), 523264   ;;  %s282_s29 = sand.u32 (!%p250_p9), 1, %s1282_s25  }
   0xe   : > { %253 = sbr.rel (%p250_p9) target bundleno = 744 (0x2e8), region = 48  ;;  %p290_p10 = scmp.lt.s32.totalorder (!%p250_p9), %s1387_s15, 24  ;;  %1064 = vmatprep.subr.bf16.mxu0 (!%p250_p9), %v1208_v0  ;;  %v1212_v3 = vld [vmem:[%s1609_s3] sm:$0xff] (!%p250_p9)   ;;  %v1213_v4 = vld [vmem:[%s1609_s3 + $0x8] sm:$0xff] (!%p250_p9)   ;;  %v1211_v7 = vld [vmem:[%s1607_s1 + $0x18] sm:$0xff] (!%p250_p9)  }
   0xf   : > { %1065 = vmatpush3.bf16.msra.mxu0 (!%p250_p9), %v1208_v0  ;;  %1088 = vmatprep.subr.bf16.mxu1 (!%p250_p9), %v1212_v3  ;;  %v1214_v9 = vld [vmem:[%s1609_s3 + $0x10] sm:$0xff] (!%p250_p9)   ;;  %v1215_v14 = vld [vmem:[%s1609_s3 + $0x18] sm:$0xff] (!%p250_p9)   ;;  %v1216_v17 = vld [vmem:[%s1609_s3 + $0x20] sm:$0xff] (!%p250_p9)   ;;  %s976_s8 = sshll.u32 (!%p250_p9), %s282_s29, 7  ;;  %s1545_s17 = scalar_lea.sflag (!%p250_p9), [#allocation3], %s282_s29 }
  0x10   : > { %1066 = vmatprep.subr.bf16.mxu0 (!%p250_p9), %v1209_v1  ;;  %1089 = vmatpush3.bf16.msra.mxu1 (!%p250_p9), %v1212_v3  ;;  %v1217_v22 = vld [vmem:[%s1609_s3 + $0x28] sm:$0xff] (!%p250_p9)   ;;  %v1218_v34 = vld [vmem:[%s1609_s3 + $0x30] sm:$0xff] (!%p250_p9)   ;;  %v1219_v35 = vld [vmem:[%s1609_s3 + $0x38] sm:$0xff] (!%p250_p9)   ;;  %s1525_s16 = scalar_lea.vmem (!%p250_p9), [#allocation2], %s976_s8 }
  0x11   : > { %1090 = vmatprep.subr.bf16.mxu1 (!%p250_p9), %v1213_v4  ;;  %v1220_v36 = vld [vmem:[%s1611_s5] sm:$0xff] (!%p250_p9)   ;;  %v1221_v37 = vld [vmem:[%s1611_s5 + $0x8] sm:$0xff] (!%p250_p9)   ;;  %v1222_v38 = vld [vmem:[%s1611_s5 + $0x10] sm:$0xff] (!%p250_p9)  }
  0x12   : > { %v1465_v39 = vld [vmem:[%s1611_s5 + $0x18] sm:$0xff] (!%p250_p9)   ;;  %v1471_v40 = vld [vmem:[%s1611_s5 + $0x20] sm:$0xff] (!%p250_p9)   ;;  %v1478_v41 = vld [vmem:[%s1611_s5 + $0x28] sm:$0xff] (!%p250_p9)  }
  0x13   : > { %1067 = vmatpush3.bf16.msra.mxu0 (!%p250_p9), %v1209_v1  ;;  %v1486_v42 = vld [vmem:[%s1608_s2] ss:$0 sm:$0xff] (!%p250_p9) }
  0x14   : > { %1068 = vmatprep.subr.bf16.mxu0 (!%p250_p9), %v1210_v2  ;;  %1091 = vmatpush3.bf16.msra.mxu1 (!%p250_p9), %v1213_v4 }
  0x15   : > { %s291_s20 = scalar_select %p290_p10, %s1387_s15, 24  ;;  %1092 = vmatprep.subr.bf16.mxu1 %v1214_v9 }
  0x16   : > { %s899_s18 = ssub.s32 (%p1373_p5), 25, %s1387_s15 }
  0x17   : > { %s978_s23 = sshll.u32 %s291_s20, 3  ;;  %1069 = vmatpush3.bf16.msra.mxu0 %v1210_v2  ;;  %p900_p11 = scmp.lt.s32.totalorder (%p1373_p5), %s899_s18, 16 }
  0x18   : > { %s1406_s14 = scalar_lea.vmem %s1606_s0, %s978_s23  ;;  %1070 = vmatprep.subr.bf16.mxu0 %v1211_v7  ;;  %1093 = vmatpush3.bf16.msra.mxu1 %v1214_v9 }
  0x19   : > { %v305_v5 = vld [vmem:[%s1406_s14] sm:$0xff]  ;;  %v306_v6 = vld [vmem:[%s1406_s14 + $0x8] sm:$0xff]  ;;  %v307_v10 = vld [vmem:[%s1406_s14 + $0x10] sm:$0xff]  ;;  %1094 = vmatprep.subr.bf16.mxu1 %v1215_v14 }
  0x1a   : > { %v321_v8 = vpack.c.bf16 %v306_v6, %v305_v5  ;;  %v308_v11 = vld [vmem:[%s1406_s14 + $0x18] sm:$0xff]  ;;  %v309_v12 = vld [vmem:[%s1406_s14 + $0x20] sm:$0xff]  ;;  %v310_v13 = vld [vmem:[%s1406_s14 + $0x28] sm:$0xff] }
  0x1b   : > { %v322_v15 = vpack.c.bf16 %v308_v11, %v307_v10  ;;  %1071 = vmatpush3.bf16.msra.mxu0 %v1211_v7  ;;  %v323_v16 = vpack.c.bf16 %v310_v13, %v309_v12  ;;  %v311_v18 = vld [vmem:[%s1406_s14 + $0x30] sm:$0xff]  ;;  %v312_v19 = vld [vmem:[%s1406_s14 + $0x38] sm:$0xff]  ;;  %v313_v20 = vld [vmem:[%s1406_s14 + $0x40] sm:$0xff] }
  0x1c   : > { %1072 = vmatprep.mubr.msk.bf16.mxu0 %vm368_vm0, %v321_v8  ;;  %v314_v21 = vld [vmem:[%s1406_s14 + $0x48] sm:$0xff]  ;;  %1095 = vmatpush3.bf16.msra.mxu1 %v1215_v14  ;;  %v324_v23 = vpack.c.bf16 %v312_v19, %v311_v18  ;;  %v315_v25 = vld [vmem:[%s1406_s14 + $0x50] sm:$0xff]  ;;  %v316_v26 = vld [vmem:[%s1406_s14 + $0x58] sm:$0xff] }
  0x1d   : > { %1096 = vmatprep.subr.bf16.mxu1 %v1216_v17  ;;  %v325_v24 = vpack.c.bf16 %v314_v21, %v313_v20  ;;  %v317_v27 = vld [vmem:[%s1406_s14 + $0x60] sm:$0xff]  ;;  %v318_v28 = vld [vmem:[%s1406_s14 + $0x68] sm:$0xff]  ;;  %v326_v29 = vpack.c.bf16 %v316_v26, %v315_v25  ;;  %v319_v31 = vld [vmem:[%s1406_s14 + $0x70] sm:$0xff]  ;;  %1120 = vmatprep.subr.bf16.mxu0 %v1220_v36 }
  0x1e   : > { %1073 = vmatmul.mubr.msk.bf16.vlgmr.msra.gmra.mrb[0].mxu0 %vm368_vm0, %v322_v15  ;;  %v327_v30 = vpack.c.bf16 %v318_v28, %v317_v27  ;;  %v320_v32 = vld [vmem:[%s1406_s14 + $0x78] sm:$0xff] }
  0x1f   : > { %1076 = vmatprep.mubr.msk.bf16.mxu0 %vm368_vm0, %v323_v16  ;;  %v328_v33 = vpack.c.bf16 %v320_v32, %v319_v31  ;;  %1121 = vmatpush3.bf16.msra.mxu0 %v1220_v36 }
  0x20   : > { %1097 = vmatpush3.bf16.msra.mxu1 %v1216_v17  ;;  %1122 = vmatprep.subr.bf16.mxu0 %v1221_v37 }
  0x21   : > { %1098 = vmatprep.subr.bf16.mxu1 %v1217_v22 }
  0x23   : > { %1123 = vmatpush3.bf16.msra.mxu0 %v1221_v37 }
  0x24   : > { %1099 = vmatpush3.bf16.msra.mxu1 %v1217_v22  ;;  %1124 = vmatprep.subr.bf16.mxu0 %v1222_v38 }
  0x25   : > { %1100 = vmatprep.subr.bf16.mxu1 %v1218_v34 }
  0x26   : > { %1077 = vmatmul.mubr.msk.bf16.gmra.mrb[4].mxu0 %vm368_vm0, %v324_v23 }
  0x27   : > { %1080 = vmatprep.mubr.msk.bf16.mxu0 %vm368_vm0, %v325_v24  ;;  %1125 = vmatpush3.bf16.msra.mxu0 %v1222_v38 }
  0x28   : > { %1101 = vmatpush3.bf16.msra.mxu1 %v1218_v34  ;;  %1126 = vmatprep.subr.bf16.mxu0 %v1465_v39 }
  0x29   : > { %1102 = vmatprep.subr.bf16.mxu1 %v1219_v35 }
  0x2b   : > { %1127 = vmatpush3.bf16.msra.mxu0 %v1465_v39 }
  0x2c   : > { %1103 = vmatpush3.bf16.msra.mxu1 %v1219_v35  ;;  %1128 = vmatprep.subr.bf16.mxu0 %v1471_v40  ;;  %v1226_v35 = vld [vmem:[%s1611_s5 + $0x30] sm:$0xff]  }
  0x2d   : > { %1152 = vmatprep.subr.bf16.mxu1 %v1220_v36 }
  0x2e   : > { %1081 = vmatmul.mubr.msk.bf16.gmra.mrb[8].mxu0 %vm368_vm0, %v326_v29 }
  0x2f   : > { %1084 = vmatprep.mubr.msk.bf16.mxu0 %vm368_vm0, %v327_v30  ;;  %1129 = vmatpush3.bf16.msra.mxu0 %v1471_v40 }
  0x30   : > { %1130 = vmatprep.subr.bf16.mxu0 %v1478_v41 }
  0x33   : > { %1131 = vmatpush3.bf16.msra.mxu0 %v1478_v41 }
  0x34   : > { %1132 = vmatprep.subr.bf16.mxu0 %v1226_v35 }
  0x36   : > { %1085 = vmatmul.mubr.msk.bf16.gmra.mrb[12].mxu0 %vm368_vm0, %v328_v33 }
  0x37   : > { %1133 = vmatpush3.bf16.msra.mxu0 %v1226_v35 }
  0xf1   : > { %v1074_v43 = vpop.f32.mrb[0].mxu0 }
  0xf2   : > { %v436_v44 = vadd.f32 %v1074_v43, %v1486_v42  ;;  %v427_v45 = vpop.f32.mrb[1].mxu0 }
  0xf3   : > { %v428_v46 = vadd.f32 %v1486_v42, %v427_v45  ;;  %v1075_v47 = vpop.f32.mrb[2].mxu0 }
  0xf4   : > { %v439_v48 = vadd.f32 %v1075_v47, %v1486_v42  ;;  %v430_v49 = vpop.f32.mrb[3].mxu0  ;;  %v492_v51 = vmax.f32 %v436_v44, 0.0 }
  0xf5   : > { %v431_v50 = vadd.f32 %v1486_v42, %v430_v49  ;;  %v490_v53 = vmax.f32 %v428_v46, 0.0 }
  0xf6   : > { %v493_v52 = vmax.f32 %v439_v48, 0.0 }
  0xf7   : > { %v491_v54 = vmax.f32 %v431_v50, 0.0 }
  0xf8   : > { %v507_v55 = vpack.c.bf16 %v493_v52, %v492_v51 }
  0xf9   : > { %v1078_v56 = vpop.f32.mrb[4].mxu0  ;;  %v506_v57 = vpack.c.bf16 %v491_v54, %v490_v53 }
  0xfa   : > { %v452_v58 = vadd.f32 %v1078_v56, %v1486_v42  ;;  %v443_v59 = vpop.f32.mrb[5].mxu0 }
  0xfb   : > { %v444_v60 = vadd.f32 %v1486_v42, %v443_v59  ;;  %v1079_v61 = vpop.f32.mrb[6].mxu0  ;;  %1104 = vmatprep.mubr.bf16.mxu1 %v506_v57 }
  0xfc   : > { %v455_v62 = vadd.f32 %v1079_v61, %v1486_v42  ;;  %v446_v63 = vpop.f32.mrb[7].mxu0  ;;  %1105 = vmatmul.mubr.bf16.vlgmr.msra.gmra.mrb[0].mxu1 %v507_v55  ;;  %v496_v1 = vmax.f32 %v452_v58, 0.0 }
  0xfd   : > { %v447_v0 = vadd.f32 %v1486_v42, %v446_v63  ;;  %1160 = vmatpush3.bf16.msra.mxu1 %v1220_v36  ;;  %v494_v3 = vmax.f32 %v444_v60, 0.0  ;;  %v1227_v36 = vld [vmem:[%s1611_s5 + $0x38] sm:$0xff]  }
  0xfe   : > { %v497_v2 = vmax.f32 %v455_v62, 0.0  ;;  %1153 = vmatprep.subr.bf16.mxu1 %v1221_v37  ;;  %1134 = vmatprep.subr.bf16.mxu0 %v1227_v36 }
  0xff   : > { %v495_v4 = vmax.f32 %v447_v0, 0.0  ;;  %1135 = vmatpush3.bf16.msra.mxu0 %v1227_v36 }
 0x100   : > { %v509_v5 = vpack.c.bf16 %v497_v2, %v496_v1 }
 0x101   : > { %v508_v6 = vpack.c.bf16 %v495_v4, %v494_v3  ;;  %v1082_v7 = vpop.f32.mrb[8].mxu0  ;;  %1161 = vmatpush3.bf16.msra.mxu1 %v1221_v37  ;;  %v992_v37 = vld [vmem:[%s1610_s4] ss:$0 sm:$0xff] }
 0x102   : > { %v468_v8 = vadd.f32 %v1082_v7, %v1486_v42  ;;  %v459_v9 = vpop.f32.mrb[9].mxu0  ;;  %1154 = vmatprep.subr.bf16.mxu1 %v1222_v38 }
 0x103   : > { %v460_v10 = vadd.f32 %v1486_v42, %v459_v9  ;;  %v1083_v11 = vpop.f32.mrb[10].mxu0  ;;  %1108 = vmatprep.mubr.bf16.mxu1 %v508_v6 }
 0x104   : > { %v471_v12 = vadd.f32 %v1083_v11, %v1486_v42  ;;  %v462_v13 = vpop.f32.mrb[11].mxu0  ;;  %1109 = vmatmul.mubr.bf16.gmra.mrb[4].mxu1 %v509_v5  ;;  %v500_v15 = vmax.f32 %v468_v8, 0.0 }
 0x105   : > { %v463_v14 = vadd.f32 %v1486_v42, %v462_v13  ;;  %1162 = vmatpush3.bf16.msra.mxu1 %v1222_v38  ;;  %v498_v17 = vmax.f32 %v460_v10, 0.0 }
 0x106   : > { %v501_v16 = vmax.f32 %v471_v12, 0.0  ;;  %1155 = vmatprep.subr.bf16.mxu1 %v1465_v39 }
 0x107   : > { %v499_v18 = vmax.f32 %v463_v14, 0.0 }
 0x108   : > { %v511_v19 = vpack.c.bf16 %v501_v16, %v500_v15 }
 0x109   : > { %v510_v20 = vpack.c.bf16 %v499_v18, %v498_v17  ;;  %v1086_v21 = vpop.f32.mrb[12].mxu0  ;;  %1163 = vmatpush3.bf16.msra.mxu1 %v1465_v39 }
 0x10a   : > { %v484_v22 = vadd.f32 %v1086_v21, %v1486_v42  ;;  %v475_v23 = vpop.f32.mrb[13].mxu0  ;;  %1156 = vmatprep.subr.bf16.mxu1 %v1471_v40 }
 0x10b   : > { %v476_v24 = vadd.f32 %v1486_v42, %v475_v23  ;;  %v1087_v25 = vpop.f32.mrb[14].mxu0  ;;  %1112 = vmatprep.mubr.bf16.mxu1 %v510_v20 }
 0x10c   : > { %v487_v26 = vadd.f32 %v1087_v25, %v1486_v42  ;;  %v478_v27 = vpop.f32.mrb[15].mxu0  ;;  %1113 = vmatmul.mubr.bf16.gmra.mrb[8].mxu1 %v511_v19  ;;  %v504_v29 = vmax.f32 %v484_v22, 0.0 }
 0x10d   : > { %v479_v28 = vadd.f32 %v1486_v42, %v478_v27  ;;  %1164 = vmatpush3.bf16.msra.mxu1 %v1471_v40  ;;  %v502_v31 = vmax.f32 %v476_v24, 0.0 }
 0x10e   : > { %v505_v30 = vmax.f32 %v487_v26, 0.0  ;;  %1157 = vmatprep.subr.bf16.mxu1 %v1478_v41 }
 0x10f   : > { %v503_v32 = vmax.f32 %v479_v28, 0.0 }
 0x110   : > { %v513_v33 = vpack.c.bf16 %v505_v30, %v504_v29  ;;  %v1001_v30 = vld [vmem:[%s1612_s6] ss:$0 sm:$0xff] }
 0x111   : > { %v512_v34 = vpack.c.bf16 %v503_v32, %v502_v31  ;;  %1165 = vmatpush3.bf16.msra.mxu1 %v1478_v41 }
 0x112   : > { %1158 = vmatprep.subr.bf16.mxu1 %v1226_v35 }
 0x113   : > { %1116 = vmatprep.mubr.bf16.mxu1 %v512_v34 }
 0x114   : > { %1117 = vmatmul.mubr.bf16.gmra.mrb[12].mxu1 %v513_v33 }
 0x115   : > { %1166 = vmatpush3.bf16.msra.mxu1 %v1226_v35 }
 0x116   : > { %1159 = vmatprep.subr.bf16.mxu1 %v1227_v36 }
 0x119   : > { %1167 = vmatpush3.bf16.msra.mxu1 %v1227_v36 }
 0x1cf   : > { %v1106_v38 = vpop.f32.mrb[0].mxu1 }
 0x1d0   : > { %v628_v39 = vadd.f32 %v1106_v38, %v992_v37  ;;  %v619_v40 = vpop.f32.mrb[1].mxu1 }
 0x1d1   : > { %v620_v41 = vadd.f32 %v992_v37, %v619_v40  ;;  %v1107_v42 = vpop.f32.mrb[2].mxu1 }
 0x1d2   : > { %v631_v43 = vadd.f32 %v1107_v42, %v992_v37  ;;  %v622_v44 = vpop.f32.mrb[3].mxu1  ;;  %v684_v46 = vmax.f32 %v628_v39, 0.0 }
 0x1d3   : > { %v623_v45 = vadd.f32 %v992_v37, %v622_v44  ;;  %v682_v48 = vmax.f32 %v620_v41, 0.0 }
 0x1d4   : > { %v685_v47 = vmax.f32 %v631_v43, 0.0 }
 0x1d5   : > { %v683_v49 = vmax.f32 %v623_v45, 0.0 }
 0x1d6   : > { %v699_v50 = vpack.c.bf16 %v685_v47, %v684_v46 }
 0x1d7   : > { %v698_v51 = vpack.c.bf16 %v683_v49, %v682_v48  ;;  %v1110_v52 = vpop.f32.mrb[4].mxu1 }
 0x1d8   : > { %v644_v53 = vadd.f32 %v1110_v52, %v992_v37  ;;  %v635_v54 = vpop.f32.mrb[5].mxu1 }
 0x1d9   : > { %v636_v55 = vadd.f32 %v992_v37, %v635_v54  ;;  %v1111_v56 = vpop.f32.mrb[6].mxu1  ;;  %1136 = vmatprep.mubr.bf16.mxu0 %v698_v51 }
 0x1da   : > { %v647_v57 = vadd.f32 %v1111_v56, %v992_v37  ;;  %v638_v58 = vpop.f32.mrb[7].mxu1  ;;  %1137 = vmatmul.mubr.bf16.vlgmr.msra.gmra.mrb[16].mxu0 %v699_v50  ;;  %v688_v60 = vmax.f32 %v644_v53, 0.0 }
 0x1db   : > { %v639_v59 = vadd.f32 %v992_v37, %v638_v58  ;;  %v686_v62 = vmax.f32 %v636_v55, 0.0 }
 0x1dc   : > { %v689_v61 = vmax.f32 %v647_v57, 0.0 }
 0x1dd   : > { %v687_v63 = vmax.f32 %v639_v59, 0.0 }
 0x1de   : > { %v701_v0 = vpack.c.bf16 %v689_v61, %v688_v60 }
 0x1df   : > { %v700_v1 = vpack.c.bf16 %v687_v63, %v686_v62  ;;  %v1114_v2 = vpop.f32.mrb[8].mxu1 }
 0x1e0   : > { %v660_v3 = vadd.f32 %v1114_v2, %v992_v37  ;;  %v651_v4 = vpop.f32.mrb[9].mxu1 }
 0x1e1   : > { %v652_v5 = vadd.f32 %v992_v37, %v651_v4  ;;  %v1115_v6 = vpop.f32.mrb[10].mxu1  ;;  %1140 = vmatprep.mubr.bf16.mxu0 %v700_v1 }
 0x1e2   : > { %v663_v7 = vadd.f32 %v1115_v6, %v992_v37  ;;  %v654_v8 = vpop.f32.mrb[11].mxu1  ;;  %1141 = vmatmul.mubr.bf16.gmra.mrb[20].mxu0 %v701_v0  ;;  %v692_v10 = vmax.f32 %v660_v3, 0.0 }
 0x1e3   : > { %v655_v9 = vadd.f32 %v992_v37, %v654_v8  ;;  %v690_v12 = vmax.f32 %v652_v5, 0.0 }
 0x1e4   : > { %v693_v11 = vmax.f32 %v663_v7, 0.0 }
 0x1e5   : > { %v691_v13 = vmax.f32 %v655_v9, 0.0 }
 0x1e6   : > { %v703_v14 = vpack.c.bf16 %v693_v11, %v692_v10 }
 0x1e7   : > { %v702_v15 = vpack.c.bf16 %v691_v13, %v690_v12  ;;  %v1118_v16 = vpop.f32.mrb[12].mxu1 }
 0x1e8   : > { %v676_v17 = vadd.f32 %v1118_v16, %v992_v37  ;;  %v667_v18 = vpop.f32.mrb[13].mxu1 }
 0x1e9   : > { %v668_v19 = vadd.f32 %v992_v37, %v667_v18  ;;  %v1119_v20 = vpop.f32.mrb[14].mxu1  ;;  %1144 = vmatprep.mubr.bf16.mxu0 %v702_v15 }
 0x1ea   : > { %v679_v21 = vadd.f32 %v1119_v20, %v992_v37  ;;  %v670_v22 = vpop.f32.mrb[15].mxu1  ;;  %1145 = vmatmul.mubr.bf16.gmra.mrb[24].mxu0 %v703_v14  ;;  %v696_v24 = vmax.f32 %v676_v17, 0.0 }
 0x1eb   : > { %v671_v23 = vadd.f32 %v992_v37, %v670_v22  ;;  %v694_v26 = vmax.f32 %v668_v19, 0.0 }
 0x1ec   : > { %v697_v25 = vmax.f32 %v679_v21, 0.0 }
 0x1ed   : > { %v695_v27 = vmax.f32 %v671_v23, 0.0 }
 0x1ee   : > { %v705_v28 = vpack.c.bf16 %v697_v25, %v696_v24 }
 0x1ef   : > { %v704_v29 = vpack.c.bf16 %v695_v27, %v694_v26 }
 0x1f1   : > { %1148 = vmatprep.mubr.bf16.mxu1 %v704_v29 }
 0x1f2   : > { %1149 = vmatmul.mubr.bf16.vlgmr.msra.gmra.mrb[16].mxu1 %v705_v28 }
 0x2ad   : > { %v1138_v31 = vpop.f32.mrb[16].mxu0 }
 0x2ae   : > { %v820_v32 = vadd.f32 %v1138_v31, %v1001_v30  ;;  %v811_v33 = vpop.f32.mrb[17].mxu0 }
 0x2af   : > { %v812_v34 = vadd.f32 %v1001_v30, %v811_v33  ;;  %v1139_v35 = vpop.f32.mrb[18].mxu0 }
 0x2b0   : > { %876 = vst [vmem:[%s1525_s16 + $0x10] sm:$0xff] %v820_v32  ;;  %v823_v36 = vadd.f32 %v1139_v35, %v1001_v30  ;;  %v814_v37 = vpop.f32.mrb[19].mxu0 }
 0x2b1   : > { %874 = vst [vmem:[%s1525_s16] sm:$0xff] %v812_v34  ;;  %v815_v38 = vadd.f32 %v1001_v30, %v814_v37 }
 0x2b2   : > { %877 = vst [vmem:[%s1525_s16 + $0x18] sm:$0xff] %v823_v36 }
 0x2b3   : > { %875 = vst [vmem:[%s1525_s16 + $0x8] sm:$0xff] %v815_v38 }
 0x2b5   : > { %v1142_v39 = vpop.f32.mrb[20].mxu0 }
 0x2b6   : > { %v836_v40 = vadd.f32 %v1142_v39, %v1001_v30  ;;  %v827_v41 = vpop.f32.mrb[21].mxu0 }
 0x2b7   : > { %v828_v42 = vadd.f32 %v1001_v30, %v827_v41  ;;  %v1143_v43 = vpop.f32.mrb[22].mxu0 }
 0x2b8   : > { %880 = vst [vmem:[%s1525_s16 + $0x30] sm:$0xff] %v836_v40  ;;  %v839_v44 = vadd.f32 %v1143_v43, %v1001_v30  ;;  %v830_v45 = vpop.f32.mrb[23].mxu0 }
 0x2b9   : > { %878 = vst [vmem:[%s1525_s16 + $0x20] sm:$0xff] %v828_v42  ;;  %v831_v46 = vadd.f32 %v1001_v30, %v830_v45 }
 0x2ba   : > { %881 = vst [vmem:[%s1525_s16 + $0x38] sm:$0xff] %v839_v44 }
 0x2bb   : > { %879 = vst [vmem:[%s1525_s16 + $0x28] sm:$0xff] %v831_v46 }
 0x2bd   : > { %v1146_v47 = vpop.f32.mrb[24].mxu0 }
 0x2be   : > { %v852_v48 = vadd.f32 %v1146_v47, %v1001_v30  ;;  %v843_v49 = vpop.f32.mrb[25].mxu0 }
 0x2bf   : > { %v844_v50 = vadd.f32 %v1001_v30, %v843_v49  ;;  %v1147_v51 = vpop.f32.mrb[26].mxu0 }
 0x2c0   : > { %884 = vst [vmem:[%s1525_s16 + $0x50] sm:$0xff] %v852_v48  ;;  %v855_v52 = vadd.f32 %v1147_v51, %v1001_v30  ;;  %v846_v53 = vpop.f32.mrb[27].mxu0 }
 0x2c1   : > { %882 = vst [vmem:[%s1525_s16 + $0x40] sm:$0xff] %v844_v50  ;;  %v847_v54 = vadd.f32 %v1001_v30, %v846_v53 }
 0x2c2   : > { %885 = vst [vmem:[%s1525_s16 + $0x58] sm:$0xff] %v855_v52 }
 0x2c3   : > { %883 = vst [vmem:[%s1525_s16 + $0x48] sm:$0xff] %v847_v54 }
 0x2c5   : > { %v1150_v55 = vpop.f32.mrb[16].mxu1  ;;  %897 = sbr.rel (!%p1373_p5) target bundleno = 744 (0x2e8), region = 52 }
 0x2c6   : > { %v868_v56 = vadd.f32 %v1150_v55, %v1001_v30  ;;  %v859_v57 = vpop.f32.mrb[17].mxu1 }
 0x2c7   : > { %v860_v58 = vadd.f32 %v1001_v30, %v859_v57  ;;  %v1151_v59 = vpop.f32.mrb[18].mxu1 }
 0x2c8   : > { %888 = vst [vmem:[%s1525_s16 + $0x70] sm:$0xff] %v868_v56  ;;  %v871_v60 = vadd.f32 %v1151_v59, %v1001_v30  ;;  %v862_v61 = vpop.f32.mrb[19].mxu1 }
 0x2c9   : > { %886 = vst [vmem:[%s1525_s16 + $0x60] sm:$0xff] %v860_v58  ;;  %v863_v62 = vadd.f32 %v1001_v30, %v862_v61 }
 0x2ca   : > { %889 = vst [vmem:[%s1525_s16 + $0x78] sm:$0xff] %v871_v60 }
 0x2cb   : > { %887 = vst [vmem:[%s1525_s16 + $0x68] sm:$0xff] %v863_v62 }
 0x2cc   : > { %s1621_s18 = smov (!%p900_p11, %s899_s18), 16 }
 0x2cd   : > { %s1550_s19 = sshll.u32 %s1621_s18, 7 }
 0x2ce   : > { %s904_s14 = ssub.s32 2048, %s1550_s19 }
 0x2cf   : > { %905 = vsyncadd %s1545_s17, %s904_s14  ;;  %p1013_p12 = scmp.ne.s32.totalorder %s1550_s19, 0  ;;  %s1019_s20 = sshll.u32 %s1356_s28, 11 }
 0x2d0   : > { %s1559_s22 = scalar_lea.hbm %s1613_s7, %s1019_s20  ;;  %s910_s15 = sshll.u32 %s1525_s16, 4  ;;  %s1562_s15 = int_to_ptr.vmem [resolvable:$true] %s910_s15 }
 0x2d1   : > { %s1228_s23 = scalar_lea.vmem %s1562_s15, %s1550_s19  ;;  %s1292_s29 = smov [#allocation2]  }
 0x2d2   : > { %p1229_p13 = scmp.ne.s32.totalorder %s1562_s15, %s1228_s23  ;;  %s1232_s8 = sshll.u32 %s1292_s29, 4  ;;  %s1233_s8 = int_to_ptr.vmem [resolvable:$false] %s1232_s8 }
 0x2d3   : > { %s1234_s28 = scalar_lea.vmem %s1233_s8, 4096  ;;  %p1235_p2 = scmp.lt.s32.totalorder %s1562_s15, %s1233_s8 }
 0x2d4   : > { %p1230_p0 = pnand %p1229_p13, %p1013_p12  ;;  %p1236_p3 = scmp.lt.s32.totalorder %s1234_s28, %s1228_s23 }
 0x2d6   : > { %p1231_p1 = pneg %p1230_p0  ;;  %p1237_p4 = por %p1236_p3, %p1235_p2 }
 0x2d8   : > { %p1238_p5 = pnand %p1237_p4, %p1231_p1 }
 0x2da   : > { %1241 = shalt.err (!%p1238_p5)
}
 0x2db   : > { %s1242_s9 = scalar_lea.hbm %s1559_s22, %s1550_s19  ;;  %s1246_s18 = scalar_lea.hbm %s1613_s7, 3200 }
 0x2dc   : > { %p1243_p7 = scmp.ne.s32.totalorder %s1559_s22, %s1242_s9  ;;  %p1247_p10 = scmp.lt.u32.totalorder %s1559_s22, %s1613_s7 }
 0x2dd   : > { %p1248_p11 = scmp.lt.u32.totalorder %s1246_s18, %s1242_s9  ;;  %p1250_p0 = scmp.lt.u32.totalorder %s1242_s9, %s1559_s22 }
 0x2de   : > { %p1244_p8 = pnand %p1243_p7, %p1013_p12 }
 0x2df   : > { %p1249_p13 = por %p1248_p11, %p1247_p10 }
 0x2e0   : > { %p1245_p9 = pneg %p1244_p8 }
 0x2e1   : > { %p1251_p1 = por %p1250_p0, %p1249_p13 }
 0x2e3   : > { %p1252_p2 = pnand %p1251_p1, %p1245_p9 }
 0x2e5   : > { %1255 = shalt.err (!%p1252_p2)
}
 0x2e6   : > { %s1293_s21 = smov 128   ;;  %s1294_s11 = smov 8  }
 0x2e7   : > { %916 = dma.vmem_to_hbm [thread:$0]  (%p1013_p12), %s1562_s15, %s1550_s19, %s1559_s22, %s1545_s17, %s1293_s21, %s1293_s21, %s1294_s11  }
 0x2e8 PF: > { %p1173_p3 = scmp.ge.s32.totalorder %s1290_s27, 2  ;;  %s925_s23 = sand.u32 1, %s1278_s24  }
 0x2e9   : > { %s926_s29 = scalar_lea.sflag [#allocation3], %s925_s23 }
 0x2ea   : > { %p1170_p4 = pnand %p1173_p3, %p1377_p6 }
 0x2ec   : > { %1273 = dma.done.wait (!%p1170_p4), %s926_s29, 2048  }
 0x2ed   : > { %1275 = vsyncadd (!%p1170_p4), %s926_s29, 4294965248  ;;  %p17_p5 = scmp.ge.s32.totalorder %s1360_s30, 4   ;;  %s1616_s24 = smov %s1282_s25 }
 0x2ee   : > { %s1617_s25 = smov %s1286_s26  ;;  %s1618_s26 = smov %s1371_s10 }
 0x2ef   : > { %s1619_s27 = smov %s1360_s30  ;;  %19 = sbr.rel (!%p17_p5) target bundleno = 3 (0x3), region = 83 }
 0x2f6   :  { %931 = vsyncpa [#allocation3], 1 }
 0x2f7   :  { %933 = vsyncpa [#allocation3 + $0x1], 1 }

</bundles_post_ra>
